<compile_context>
chip_gen: v6e
topology: v6e:2x2x1
jax: 0.10.0
libtpu: 0.0.40
codegen_flags: <defaults>
</compile_context>

<pallas_src>
import jax
import jax.numpy as jnp
from jax.experimental import pallas as pl
from jax.experimental.pallas import tpu as pltpu


def _attention_kernel(x_ref, w_ref, b_ref, vec_ref, probs_ref):
    """Shared 2-D kernel body (used by both layout paths).

    x_ref:     (T, tL)  lane-dense slab; one column per (batch, dim) element.
    w_ref:     (T, T)   Linear weight   (constant block index -> VMEM resident).
    b_ref:     (T, 128) Linear bias, lane-broadcast in the wrapper (unmasked vld).
    vec_ref:   (1, tL)  attention_vec slab   (lane-dense, unmasked vst).
    probs_ref: (T, tL)  attention_probs slab (lane-dense, unmasked vst).
    """
    x = x_ref[...]
    w = w_ref[...]

    # MXU matmul, f32 accumulation:
    #   aw[t_out, col] = sum_tin W[t_out, t_in] * x[t_in, col] + bias[t_out]
    aw = jnp.dot(w, x, preferred_element_type=jnp.float32)
    aw = aw + b_ref[...][:, :1].astype(jnp.float32)   # bias broadcast over lanes

    # Numerically-stable softmax over t_out (the sublane axis), per lane column.
    m = jnp.max(aw, axis=0, keepdims=True)
    e = jnp.exp(aw - m)
    denom = jnp.sum(e, axis=0, keepdims=True)
    probs = e / denom   # exact divide: memory-bound kernel, keeps probs bit-close to ref

    probs_ref[...] = probs.astype(probs_ref.dtype)
    vec = jnp.sum(probs * x.astype(jnp.float32), axis=0, keepdims=True)
    vec_ref[...] = vec.astype(vec_ref.dtype)


def _vmem_budget_and_limit():
    """Generation-aware scoped-VMEM limit and block budget.

    v5e/v6e (128 MiB physical): raise the scoped limit to 64 MiB and target
    ~32 MiB for the pipelined x/probs blocks.  v7x (64 MiB physical): 32 MiB
    scoped limit, ~16 MiB block budget.  Falls back to the v7x-safe numbers if
    the hardware query is unavailable.
    """
    try:
        cap = int(pltpu.get_tpu_info().vmem_capacity_bytes)
    except Exception:
        cap = 64 << 20                    # conservative (v7x-sized VMEM)
    limit = min(cap // 2, 64 << 20)       # raised scoped limit
    return limit // 2, limit              # (block budget, vmem_limit_bytes)


def _pick_lane_tile(n_lanes, t, *, elem_bytes=4, vmem_budget=16 << 20,
                    min_block_bytes=512 << 10, outer_steps=1):
    """Pick the lane-tile width for the (padded) lane axis of extent `n_lanes`.

    Picks the largest multiple-of-128 divisor whose double-buffered x + probs
    blocks (plus f32 temporaries) fit `vmem_budget`; if the total step count
    (outer_steps * lane steps) is odd, trims to an even step count so both v7x
    TensorCores stay busy, but never below ~min_block_bytes per x block (small
    blocks fall well short of the HBM roofline).
    """
    assert n_lanes % 128 == 0, n_lanes
    divisors = [d for d in range(128, n_lanes + 1, 128) if n_lanes % d == 0]

    def vmem_use(tile):
        io = 2 * (2 * t * tile + 2 * tile) * elem_bytes   # x/probs/vec blocks, double-buffered
        temps = 4 * t * tile * 4                          # f32 aw / exp / probs / x temporaries
        return io + temps

    fitting = [d for d in divisors if vmem_use(d) <= vmem_budget] or [128]
    tile = fitting[-1]

    if (outer_steps * (n_lanes // tile)) % 2 != 0:
        floor = min(min_block_bytes, t * tile * elem_bytes)
        even = [d for d in fitting
                if (outer_steps * (n_lanes // d)) % 2 == 0
                and t * d * elem_bytes >= floor]
        if even:
            tile = even[-1]
    return tile


def _block_spec(shape, index_map, buffer_count=None):
    if buffer_count is None:
        return pl.BlockSpec(shape, index_map)
    # Optional deeper pipelining for small-block regimes (sweep 2 vs 3).
    return pl.BlockSpec(shape, index_map, pipeline_mode=pl.Buffered(buffer_count))


def attention_block(inputs, weight, bias, *, lane_tile=None, buffer_count=None):
    """inputs: (B, T, D); weight: (T, T); bias: (T,).

    Returns (attention_vec (B, D), attention_probs (B, T, D)), matching the
    PyTorch AttentionBlock.forward semantics.
    """
    B, T, D = inputs.shape
    dtype = inputs.dtype
    elem = jnp.dtype(dtype).itemsize
    vmem_budget, vmem_limit = _vmem_budget_and_limit()

    # Lane-broadcast the bias so its (resident) block load is an unmasked vld.
    bias_tile = jnp.broadcast_to(bias.reshape(T, 1), (T, 128))

    if D % 128 == 0:
        # --- Primary path: tile the original (B, T, D) layout directly -------
        tD = lane_tile or _pick_lane_tile(
            D, T, elem_bytes=elem, vmem_budget=vmem_budget, outer_steps=B)
        assert D % tD == 0, (D, tD)
        grid = (B, D // tD)

        cost = pl.CostEstimate(
            flops=2 * T * T * B * D + 6 * T * B * D,
            transcendentals=T * B * D,
            bytes_accessed=(2 * T * B * D + B * D + T * T + T * 128) * elem,
        )

        vec3d, probs = pl.pallas_call(
            _attention_kernel,
            out_shape=(
                jax.ShapeDtypeStruct((B, 1, D), dtype),   # attention_vec
                jax.ShapeDtypeStruct((B, T, D), dtype),   # attention_probs
            ),
            grid_spec=pltpu.PrefetchScalarGridSpec(
                num_scalar_prefetch=0,
                grid=grid,
                in_specs=[
                    _block_spec((None, T, tD), lambda b, j: (b, 0, j), buffer_count),
                    pl.BlockSpec((T, T), lambda b, j: (0, 0)),      # W resident
                    pl.BlockSpec((T, 128), lambda b, j: (0, 0)),    # bias resident
                ],
                out_specs=[
                    pl.BlockSpec((None, 1, tD), lambda b, j: (b, 0, j)),
                    _block_spec((None, T, tD), lambda b, j: (b, 0, j), buffer_count),
                ],
            ),
            compiler_params=pltpu.CompilerParams(
                dimension_semantics=("parallel", "parallel"),
                vmem_limit_bytes=vmem_limit,
            ),
            cost_estimate=cost,
        )(inputs, weight, bias_tile)
        return vec3d.reshape(B, D), probs

    # --- Fallback path (lane-unfriendly D): fold batch into lanes + pad ------
    N = B * D
    N_pad = pl.cdiv(N, 128) * 128
    x2d = jnp.transpose(inputs, (1, 0, 2)).reshape(T, N)
    if N_pad != N:
        x2d = jnp.pad(x2d, ((0, 0), (0, N_pad - N)))

    tN = lane_tile or _pick_lane_tile(
        N_pad, T, elem_bytes=elem, vmem_budget=vmem_budget, outer_steps=1)
    assert N_pad % tN == 0, (N_pad, tN)
    grid = (N_pad // tN,)

    cost = pl.CostEstimate(
        flops=2 * T * T * N_pad + 6 * T * N_pad,
        transcendentals=T * N_pad,
        bytes_accessed=(2 * T * N_pad + N_pad + T * T + T * 128) * elem,
    )

    vec2d, probs2d = pl.pallas_call(
        _attention_kernel,
        out_shape=(
            jax.ShapeDtypeStruct((1, N_pad), dtype),
            jax.ShapeDtypeStruct((T, N_pad), dtype),
        ),
        grid_spec=pltpu.PrefetchScalarGridSpec(
            num_scalar_prefetch=0,
            grid=grid,
            in_specs=[
                _block_spec((T, tN), lambda j: (0, j), buffer_count),
                pl.BlockSpec((T, T), lambda j: (0, 0)),
                pl.BlockSpec((T, 128), lambda j: (0, 0)),
            ],
            out_specs=[
                pl.BlockSpec((1, tN), lambda j: (0, j)),
                _block_spec((T, tN), lambda j: (0, j), buffer_count),
            ],
        ),
        compiler_params=pltpu.CompilerParams(
            dimension_semantics=("parallel",),
            vmem_limit_bytes=vmem_limit,
        ),
        cost_estimate=cost,
    )(x2d, weight, bias_tile)

    vec = vec2d[0, :N].reshape(B, D)
    probs = jnp.transpose(probs2d[:, :N].reshape(T, B, D), (1, 0, 2))
    return vec, probs


def attention_block_ref(inputs, weight, bias):
    """Pure-JAX reference mirroring the PyTorch forward exactly."""
    inputs_t = jnp.transpose(inputs, (0, 2, 1))                   # (B, D, T)
    aw = jnp.einsum("bdt,ot->bdo", inputs_t, weight) + bias       # (B, D, T)
    probs = jax.nn.softmax(aw, axis=-1)                           # (B, D, T)
    probs = jnp.transpose(probs, (0, 2, 1))                       # (B, T, D)
    vec = jnp.sum(probs * inputs, axis=1)                         # (B, D)
    return vec, probs


if __name__ == "__main__":
    key = jax.random.PRNGKey(0)
    kx, kw, kb, kx2 = jax.random.split(key, 4)

    T = 8
    bound = 1.0 / (T ** 0.5)  # torch-default Linear(time_step, time_step) init scale
    weight = jax.random.uniform(kw, (T, T), minval=-bound, maxval=bound, dtype=jnp.float32)
    bias = jax.random.uniform(kb, (T,), minval=-bound, maxval=bound, dtype=jnp.float32)

    # Case 1: lane-friendly dim (D % 128 == 0) -> primary no-transpose path.
    B, D = 4, 128
    inputs = jax.random.normal(kx, (B, T, D), dtype=jnp.float32)
    vec, probs = attention_block(inputs, weight, bias)
    vec = jax.block_until_ready(vec)
    probs = jax.block_until_ready(probs)
    vec_r, probs_r = attention_block_ref(inputs, weight, bias)
    assert vec.shape == (B, D) and probs.shape == (B, T, D)
    # Tolerance covers MXU-vs-XLA matmul precision differences (f32, T=8).
    assert jnp.allclose(vec, vec_r, atol=2e-3, rtol=2e-3)
    assert jnp.allclose(probs, probs_r, atol=2e-3, rtol=2e-3)

    # Case 2: lane-unfriendly dim -> batch-folded + lane-padded fallback path.
    B2, D2 = 3, 48
    inputs2 = jax.random.normal(kx2, (B2, T, D2), dtype=jnp.float32)
    vec2, probs2 = attention_block(inputs2, weight, bias)
    vec2 = jax.block_until_ready(vec2)
    probs2 = jax.block_until_ready(probs2)
    vec2_r, probs2_r = attention_block_ref(inputs2, weight, bias)
    assert vec2.shape == (B2, D2) and probs2.shape == (B2, T, D2)
    assert jnp.allclose(vec2, vec2_r, atol=2e-3, rtol=2e-3)
    assert jnp.allclose(probs2, probs2_r, atol=2e-3, rtol=2e-3)

    print("KERNEL_OK")
</pallas_src>

<mosaic_0001>
module attributes {stable_mosaic.version = 11 : i64} {
  func.func @_attention_kernel(%arg0: i32, %arg1: i32, %arg2: memref<1x8x128xf32, #tpu.memory_space<vmem>>, %arg3: memref<8x8xf32, #tpu.memory_space<vmem>>, %arg4: memref<8x128xf32, #tpu.memory_space<vmem>>, %arg5: memref<1x1x128xf32, #tpu.memory_space<vmem>>, %arg6: memref<1x8x128xf32, #tpu.memory_space<vmem>>) attributes {dimension_semantics = [#tpu.dimension_semantics<parallel>, #tpu.dimension_semantics<parallel>], iteration_bounds = array<i64: 4, 1>, scalar_prefetch = 0 : i64, scratch_operands = 0 : i64, tpu.core_type = #tpu.core_type<tc>, window_params = [{transform_indices = @transform_0, window_bounds = array<i64: 1, 8, 128>}, {pipeline_mode = #tpu.pipeline_mode<synchronous>, transform_indices = @transform_1, window_bounds = array<i64: 8, 8>}, {pipeline_mode = #tpu.pipeline_mode<synchronous>, transform_indices = @transform_2, window_bounds = array<i64: 8, 128>}, {transform_indices = @transform_3, window_bounds = array<i64: 1, 1, 128>}, {transform_indices = @transform_4, window_bounds = array<i64: 1, 8, 128>}]} {
    %c0 = arith.constant 0 : index
    %c0_0 = arith.constant 0 : index
    %c0_1 = arith.constant 0 : index
    %0 = vector.load %arg2[%c0, %c0_0, %c0_1] : memref<1x8x128xf32, #tpu.memory_space<vmem>>, vector<1x8x128xf32>
    %1 = vector.shape_cast %0 : vector<1x8x128xf32> to vector<8x128xf32>
    %c0_2 = arith.constant 0 : index
    %c0_3 = arith.constant 0 : index
    %2 = vector.load %arg3[%c0_2, %c0_3] : memref<8x8xf32, #tpu.memory_space<vmem>>, vector<8x8xf32>
    %cst = arith.constant dense<0.000000e+00> : vector<8x128xf32>
    %3 = tpu.matmul %2, %1, %cst {dimension_numbers = #tpu.dot_dimension_numbers<[1], [0], [0], [1], [0, 0, 1, 1], [], []>} : vector<8x8xf32>, vector<8x128xf32>, vector<8x128xf32> -> vector<8x128xf32>
    %c0_4 = arith.constant 0 : index
    %c0_5 = arith.constant 0 : index
    %4 = vector.load %arg4[%c0_4, %c0_5] : memref<8x128xf32, #tpu.memory_space<vmem>>, vector<8x128xf32>
    %5 = vector.extract_strided_slice %4 {offsets = [0, 0], sizes = [8, 1], strides = [1, 1]} : vector<8x128xf32> to vector<8x1xf32>
    %6 = vector.broadcast %5 : vector<8x1xf32> to vector<8x128xf32>
    %7 = arith.addf %3, %6 : vector<8x128xf32>
    %cst_6 = arith.constant dense<0xFF800000> : vector<128xf32>
    %8 = vector.multi_reduction <maximumf>, %7, %cst_6 [0] : vector<8x128xf32> to vector<128xf32>
    %9 = vector.shape_cast %8 : vector<128xf32> to vector<1x128xf32>
    %10 = vector.broadcast %9 : vector<1x128xf32> to vector<8x128xf32>
    %11 = arith.subf %7, %10 : vector<8x128xf32>
    %12 = math.exp %11 : vector<8x128xf32>
    %cst_7 = arith.constant dense<0.000000e+00> : vector<128xf32>
    %13 = vector.multi_reduction <add>, %12, %cst_7 [0] : vector<8x128xf32> to vector<128xf32>
    %14 = vector.shape_cast %13 : vector<128xf32> to vector<1x128xf32>
    %15 = vector.broadcast %14 : vector<1x128xf32> to vector<8x128xf32>
    %16 = arith.divf %12, %15 : vector<8x128xf32>
    %c0_8 = arith.constant 0 : index
    %c0_9 = arith.constant 0 : index
    %c0_10 = arith.constant 0 : index
    %17 = vector.load %arg6[%c0_8, %c0_9, %c0_10] : memref<1x8x128xf32, #tpu.memory_space<vmem>>, vector<1x8x128xf32>
    %18 = vector.shape_cast %17 : vector<1x8x128xf32> to vector<8x128xf32>
    %19 = vector.shape_cast %16 : vector<8x128xf32> to vector<1x8x128xf32>
    tpu.vector_store %arg6[%c0_8, %c0_9, %c0_10], %19 {strides = array<i32>} : memref<1x8x128xf32, #tpu.memory_space<vmem>>, vector<1x8x128xf32>,
    %20 = arith.mulf %16, %1 : vector<8x128xf32>
    %cst_11 = arith.constant dense<0.000000e+00> : vector<128xf32>
    %21 = vector.multi_reduction <add>, %20, %cst_11 [0] : vector<8x128xf32> to vector<128xf32>
    %22 = vector.shape_cast %21 : vector<128xf32> to vector<1x128xf32>
    %c0_12 = arith.constant 0 : index
    %c0_13 = arith.constant 0 : index
    %c0_14 = arith.constant 0 : index
    %23 = vector.load %arg5[%c0_12, %c0_13, %c0_14] : memref<1x1x128xf32, #tpu.memory_space<vmem>>, vector<1x1x128xf32>
    %24 = vector.shape_cast %23 : vector<1x1x128xf32> to vector<1x128xf32>
    %25 = vector.shape_cast %22 : vector<1x128xf32> to vector<1x1x128xf32>
    tpu.vector_store %arg5[%c0_12, %c0_13, %c0_14], %25 {strides = array<i32>} : memref<1x1x128xf32, #tpu.memory_space<vmem>>, vector<1x1x128xf32>,
    return
  }
  func.func @transform_0(%arg0: i32, %arg1: i32) -> (i32, i32, i32) {
    %c0_i32 = arith.constant 0 : i32
    %c0_i32_0 = arith.constant 0 : i32
    return %arg0, %c0_i32, %arg1 : i32, i32, i32
  }
  func.func @transform_1(%arg0: i32, %arg1: i32) -> (i32, i32) {
    %c0_i32 = arith.constant 0 : i32
    %c0_i32_0 = arith.constant 0 : i32
    %c0_i32_1 = arith.constant 0 : i32
    return %c0_i32, %c0_i32_0 : i32, i32
  }
  func.func @transform_2(%arg0: i32, %arg1: i32) -> (i32, i32) {
    %c0_i32 = arith.constant 0 : i32
    %c0_i32_0 = arith.constant 0 : i32
    %c0_i32_1 = arith.constant 0 : i32
    return %c0_i32, %c0_i32_0 : i32, i32
  }
  func.func @transform_3(%arg0: i32, %arg1: i32) -> (i32, i32, i32) {
    %c0_i32 = arith.constant 0 : i32
    %c0_i32_0 = arith.constant 0 : i32
    return %arg0, %c0_i32, %arg1 : i32, i32, i32
  }
  func.func @transform_4(%arg0: i32, %arg1: i32) -> (i32, i32, i32) {
    %c0_i32 = arith.constant 0 : i32
    %c0_i32_0 = arith.constant 0 : i32
    return %arg0, %c0_i32, %arg1 : i32, i32, i32
  }
}

</mosaic_0001>

<bundles_post_ra>
// kernel: tpu_custom_call.1
= control target key start
LH: loop header
LB: loop body
LE: loop exit
PB: predicated region body
PF: predicated region fallthrough
CT: control target
= control target key end

     0   :  { %10 = vsyncpa [#allocation3], 0  ;;  %s1087_s0 = inlined_call_operand.hbm [shape: f32[4,8,128], index: 0, kind: input, shape index: {}]   ;;  %s1088_s1 = inlined_call_operand.hbm [shape: f32[8,8], index: 1, kind: input, shape index: {}]   ;;  %s1089_s2 = inlined_call_operand.hbm [shape: f32[8,128], index: 2, kind: input, shape index: {}]   ;;  %s1090_s3 = inlined_call_operand.hbm [shape: f32[4,1,128], index: 3, kind: output, shape index: {0}]   ;;  %s1091_s4 = inlined_call_operand.hbm [shape: f32[4,8,128], index: 4, kind: output, shape index: {1}]  }
   0x1   :  { %12 = vsyncpa [#allocation3 + $0x1], 0 }
   0x2   :  { %13 = vsyncpa [#allocation6], 0 }
   0x3   :  { %14 = vsyncpa [#allocation4], 0 }
   0x4   :  { %16 = vsyncpa [#allocation4 + $0x1], 0 }
   0x5   :  { %17 = vsyncpa [#allocation10], 0 }
   0x6   :  { %19 = vsyncpa [#allocation10 + $0x1], 0  ;;  %s887_s15 = smov 0   ;;  %s889_s16 = smov 0  }
   0x7   :  { %s891_s17 = smov 0   ;;  %s893_s18 = smov 0  }
   0x8   :  { %s895_s19 = smov 0   ;;  %s897_s20 = smov 0  }
   0x9 LB: > { %s536_s21 = sadd.s32 4294967295, %s852_s20   ;;  %s537_s22 = sadd.s32 4294967294, %s852_s20   ;;  %s852_s20 = sphi %s897_s20, %s25_s20   ;;  %s848_s19 = sphi %s895_s19, %s1113_s19   ;;  %s844_s18 = sphi %s893_s18, %s1112_s18   ;;  %s840_s17 = sphi %s891_s17, %s1111_s17   ;;  %s836_s16 = sphi %s889_s16, %s1110_s16   ;;  %s832_s15 = sphi %s887_s15, %s1109_s15  }
   0xa   : > { %p59_p0 = scmp.ne.s32.totalorder %s836_s16, %s832_s15  ;;  %p921_p1 = scmp.eq.s32.totalorder %s536_s21, 0 }
   0xb   : > { %p925_p2 = scmp.eq.s32.totalorder %s536_s21, 3  ;;  %p133_p3 = scmp.eq.s32.totalorder %s537_s22, 3 }
   0xc   : > { %s1096_s23 = scalar_select %p921_p1, 1, 0 }
   0xd   : > { %s1097_s24 = scalar_select %p925_p2, 1, 0 }
   0xe   : > { %p931_p4 = por %p921_p1, %p59_p0  ;;  %p538_p5 = scmp.ge.s32.totalorder %s852_s20, 1 }
   0xf   : > { %p936_p6 = por %p133_p3, %p59_p0  ;;  %p168_p7 = scmp.lt.s32.totalorder %s852_s20, 5 }
  0x10   : > { %s1098_s25 = scalar_select %p931_p4, 1, 0 }
  0x11   : > { %s1099_s26 = scalar_select %p936_p6, 1, 0 }
  0x12   : > { %p941_p8 = pnand %p538_p5, %p168_p7  ;;  %s854_s28 = smov [#allocation5]  }
  0x13   : > { %s181_s29 = sshll.u32 %s854_s28, 4  ;;  %s855_s30 = smov [#allocation7]   ;;  %s182_s29 = int_to_ptr.vmem [resolvable:$true] %s181_s29 }
  0x14   : > { %s1100_s27 = scalar_select %p941_p8, 1, 0 }
  0x15   : > { %p576_p9 = pneg %p941_p8  ;;  %s192_s5 = sshll.u32 %s855_s30, 4  ;;  %s193_s5 = int_to_ptr.vmem [resolvable:$true] %s192_s5 }
  0x16   : > { %s669_s7 = scalar_lea.vmem %s182_s29, 128  ;;  %p677_p3 = scmp.lt.s32.totalorder %s182_s29, %s182_s29 }
  0x17   : > { %p949_p10 = pnand %p576_p9, %p921_p1  ;;  %p670_p12 = scmp.ne.s32.totalorder %s182_s29, %s669_s7 }
  0x18   : > { %p678_p5 = scmp.lt.s32.totalorder %s669_s7, %s669_s7 }
  0x19   : > { %p660_p11 = pneg %p949_p10 }
  0x1a   : > { %p679_p7 = por %p678_p5, %p677_p3 }
  0x1b   : > { %p672_p13 = pnand %p670_p12, %p660_p11 }
  0x1d   : > { %p673_p0 = pneg %p672_p13 }
  0x1f   : > { %p680_p6 = pnand %p679_p7, %p673_p0 }
  0x21   : > { %683 = shalt.err (!%p680_p6)
}
  0x22   : > { %579 = dma.hbm_to_vmem [thread:$0]  (!%p949_p10), %s1088_s1, 128, %s182_s29, [#allocation6]  }
  0x23   : > { %s695_s10 = scalar_lea.vmem %s193_s5, 128  ;;  %p703_p12 = scmp.lt.s32.totalorder %s193_s5, %s193_s5 }
  0x24   : > { %p696_p9 = scmp.ne.s32.totalorder %s193_s5, %s695_s10  ;;  %p704_p13 = scmp.lt.s32.totalorder %s695_s10, %s695_s10 }
  0x26   : > { %p698_p1 = pnand %p696_p9, %p660_p11  ;;  %p705_p8 = por %p704_p13, %p703_p12 }
  0x28   : > { %p699_p4 = pneg %p698_p1 }
  0x2a   : > { %p706_p2 = pnand %p705_p8, %p699_p4 }
  0x2c   : > { %709 = shalt.err (!%p706_p2)
}
  0x2d   : > { %582 = dma.hbm_to_vmem [thread:$0]  (!%p949_p10), %s1089_s2, 128, %s193_s5, [#allocation6]  }
  0x2e   : > { %s37_s13 = sadd.s32 1, %s848_s19  ;;  %s46_s14 = sadd.s32 1, %s840_s17 }
  0x2f   : > { %p39_p1 = scmp.ge.s32.totalorder %s37_s13, 4  ;;  %p53_p2 = scmp.ne.s32.totalorder %s840_s17, %s836_s16 }
  0x30   : > { %p54_p4 = scmp.eq.s32.totalorder %s852_s20, 0  ;;  %p596_p6 = scmp.lt.s32.totalorder %s852_s20, 4 }
  0x31   : > { %s1115_s13 = smov (%p39_p1, %s37_s13), 0  ;;  %p1102_p11 = scmp.ne.s32.totalorder %s1097_s24, 0 }
  0x32   : > { %p55_p8 = por %p54_p4, %p53_p2  ;;  %s41_s22 = ssub.s32 %s848_s19, %s1115_s13 }
  0x33   : > { %p981_p0 = por %p1102_p11, %p53_p2  ;;  %s203_s28 = sand.u32 1, %s840_s17  }
  0x34   : > { %p44_p3 = scmp.eq.s32.totalorder %s41_s22, 0  ;;  %s542_s29 = sshll.u32 %s203_s28, 3 }
  0x35   : > { %s543_s30 = sshll.u32 %s848_s19, 7  ;;  %s207_s9 = scalar_lea.vmem [#allocation2], %s542_s29 }
  0x36   : > { %s990_s5 = scalar_select %p44_p3, %s840_s17, %s46_s14  }
  0x37   : > { %s213_s8 = scalar_lea.hbm %s1087_s0, %s543_s30  ;;  %s215_s10 = sshll.u32 %s207_s9, 4  ;;  %s216_s10 = int_to_ptr.vmem [resolvable:$true] %s215_s10 }
  0x38   : > { %p997_p10 = pnand %p596_p6, %p55_p8  ;;  %s204_s11 = scalar_lea.sflag [#allocation3], %s203_s28 }
  0x39   : > { %s723_s12 = scalar_lea.vmem %s216_s10, 128  ;;  %s856_s14 = smov [#allocation2]  }
  0x3a   : > { %p712_p5 = pneg %p997_p10  ;;  %p724_p7 = scmp.ne.s32.totalorder %s216_s10, %s723_s12 }
  0x3b   : > { %s728_s22 = sshll.u32 %s856_s14, 4  ;;  %s729_s22 = int_to_ptr.vmem [resolvable:$false] %s728_s22 }
  0x3c   : > { %p726_p9 = pnand %p724_p7, %p712_p5  ;;  %s730_s30 = scalar_lea.vmem %s729_s22, 256 }
  0x3d   : > { %p731_p13 = scmp.lt.s32.totalorder %s216_s10, %s729_s22  ;;  %p732_p1 = scmp.lt.s32.totalorder %s730_s30, %s723_s12 }
  0x3e   : > { %p727_p12 = pneg %p726_p9 }
  0x3f   : > { %p733_p2 = por %p732_p1, %p731_p13 }
  0x41   : > { %p734_p4 = pnand %p733_p2, %p727_p12 }
  0x43   : > { %737 = shalt.err (!%p734_p4)
}
  0x44   : > { %586 = dma.hbm_to_vmem [thread:$0]  (!%p997_p10), %s213_s8, 128, %s216_s10, %s204_s11  }
  0x45   : > { %p1105_p6 = scmp.ne.s32.totalorder %s1100_s27, 0 }
  0x46   : > { %s1008_s28 = sand.u32 (!%p1105_p6), 1, %s836_s16   ;;  %p1106_p8 = scmp.ne.s32.totalorder (!%p1105_p6), %s1098_s25, 0 }
  0x47   : > { %224 = sbr.rel (%p1105_p6) target bundleno = 373 (0x175), region = 32  ;;  %s545_s29 = sshll.u32 (!%p1105_p6), %s1008_s28, 3 }
  0x48   : > { %s227_s6 = scalar_lea.sflag (!%p1105_p6), [#allocation3], %s1008_s28  ;;  %s230_s7 = scalar_lea.vmem (!%p1105_p6), [#allocation2], %s545_s29 }
  0x4c   : > { %815 = dma.done.wait (%p1106_p8), %s227_s6, 128  }
  0x4d   : > { %817 = vsyncadd (%p1106_p8), %s227_s6, 4294967168  ;;  %p1107_p11 = scmp.ne.s32.totalorder %s1096_s23, 0 }
  0x4f   : > { %819 = dma.done.wait (%p1107_p11), [#allocation6], 256  }
  0x50   : > { %821 = vsyncadd (%p1107_p11), [#allocation6], 4294967040  ;;  %v857_v0 = vmov 0.0   ;;  %vm858_vm0 = vmmov 0   ;;  %v859_v1 = vmov 0   ;;  %vm275_vm1 = vcmask 64512  }
  0x51   : > { %557 = vmatprep.subr.mxu0 %v857_v0  ;;  %559 = vmatprep.mubr.msk.f32.mxu0 %vm858_vm0, %v857_v0  ;;  %v267_v2 = vld [vmem:[%s230_s7] sm:$0xff]  ;;  %v268_v3 = vld [vmem:[#allocation5] sm:$0xff]  ;;  %v269_v4 = vld [vmem:[#allocation7] sm:$0xff]  ;;  %s552_s23 = sshll.u32 %s844_s18, 7  ;;  %s266_s25 = scalar_lea.vmem [#allocation9], %s545_s29 }
  0x52   : > { %653 = vset.pattern.permute.xlu0 %v859_v1  ;;  %558 = vmatpush3.msra.mxu0 %v267_v2  ;;  %s408_s27 = sshll.u32 %s266_s25, 4  ;;  %s1028_s10 = scalar_lea.hbm %s1091_s4, %s552_s23  ;;  %s409_s27 = int_to_ptr.vmem [resolvable:$true] %s408_s27 }
  0x53   : > { %272 = vperm.xlu0 %653, %v269_v4   ;;  %560 = vmatmul.mubr.msk.f32.vlgmr.msra.gmra.mxu0 %vm275_vm1, %v268_v3  ;;  %s380_s24 = scalar_lea.sflag [#allocation10], %s1008_s28  ;;  %s738_s11 = scalar_lea.vmem %s409_s27, 128 }
  0x54   : > { %p739_p3 = scmp.ne.s32.totalorder %s409_s27, %s738_s11  ;;  %s860_s12 = smov [#allocation9]  }
  0x55   : > { %s742_s14 = sshll.u32 %s860_s12, 4  ;;  %s743_s14 = int_to_ptr.vmem [resolvable:$false] %s742_s14 }
  0x56   : > { %p740_p10 = pnand %p739_p3, %p981_p0  ;;  %s744_s22 = scalar_lea.vmem %s743_s14, 256 }
  0x57   : > { %p745_p7 = scmp.lt.s32.totalorder %s409_s27, %s743_s14  ;;  %p746_p9 = scmp.lt.s32.totalorder %s744_s22, %s738_s11 }
  0x58   : > { %p741_p5 = pneg %p740_p10 }
  0x59   : > { %p747_p12 = por %p746_p9, %p745_p7 }
  0x5b   : > { %p748_p13 = pnand %p747_p12, %p741_p5 }
  0xce   : > { %v273_v5 = vpop.permute.xlu0 %272 }
 0x113   : > { %v345_v6 = vpop.f32.mrf.mxu0 }
 0x114   : > { %v346_v7 = vadd.f32 %v345_v6, %v273_v5 }
 0x115   : > { %v561_v8 = vpop.f32.mrf.mxu0 }
 0x116   : > { %v349_v9 = vrot.slane %v346_v7, 4 }
 0x118   : > { %v350_v10 = vmax.f32 %v346_v7, %v349_v9 }
 0x11a   : > { %v351_v11 = vrot.slane %v350_v10, 2 }
 0x11c   : > { %v352_v12 = vmax.f32 %v350_v10, %v351_v11 }
 0x11e   : > { %v353_v13 = vrot.slane %v352_v12, 1 }
 0x120   : > { %v354_v14 = vmax.f32 %v352_v12, %v353_v13 }
 0x122   : > { %v355_v15 = vsub.f32 %v346_v7, %v354_v14 }
 0x124   : > { %v356_v16 = vmul.f32 1.442695, %v355_v15 }
 0x126   : > { %654 = vpow2.f32 %v356_v16 }
 0x133   : > { %v655_v17 = vpop.eup %654 }
 0x134   : > { %v358_v18 = vrot.slane %v655_v17, 4 }
 0x136   : > { %v359_v19 = vadd.f32 %v655_v17, %v358_v18 }
 0x138   : > { %v360_v20 = vrot.slane %v359_v19, 2 }
 0x13a   : > { %v361_v21 = vadd.f32 %v360_v20, %v359_v19 }
 0x13c   : > { %v362_v22 = vrot.slane %v361_v21, 1 }
 0x13e   : > { %v363_v23 = vadd.f32 %v362_v22, %v361_v21 }
 0x140   : > { %656 = vrcp.f32 %v363_v23 }
 0x14d   : > { %v657_v24 = vpop.eup %656 }
 0x14e   : > { %v365_v25 = vmul.f32 %v657_v24, %v655_v17 }
 0x150   : > { %v367_v26 = vmul.f32 %v365_v25, %v267_v2  ;;  %366 = vst [vmem:[%s266_s25] sm:$0xff] %v365_v25 }
 0x151   : > { %751 = shalt.err (!%p748_p13)
}
 0x152   : > { %s752_s30 = scalar_lea.hbm %s1028_s10, 128  ;;  %s756_s7 = scalar_lea.hbm %s1091_s4, 512 }
 0x153   : > { %p753_p1 = scmp.ne.s32.totalorder %s1028_s10, %s752_s30  ;;  %p757_p6 = scmp.lt.s32.totalorder %s1028_s10, %s1091_s4 }
 0x154   : > { %p758_p8 = scmp.lt.s32.totalorder %s756_s7, %s752_s30 }
 0x155   : > { %p754_p2 = pnand %p753_p1, %p981_p0 }
 0x156   : > { %p759_p11 = por %p758_p8, %p757_p6 }
 0x157   : > { %p755_p4 = pneg %p754_p2 }
 0x159   : > { %p760_p3 = pnand %p759_p11, %p755_p4 }
 0x15b   : > { %763 = shalt.err (!%p760_p3)
}
 0x15c   : > { %573 = dma.vmem_to_hbm [thread:$0]  (%p981_p0), %s409_s27, 128, %s1028_s10, %s380_s24   ;;  %v368_v27 = vrot.slane %v367_v26, 4 }
 0x15d   : > { %s551_s8 = sshll.u32 %s844_s18, 4  ;;  %s259_s9 = scalar_lea.vmem [#allocation8], %s1008_s28 }
 0x15e   : > { %v369_v28 = vadd.f32 %v368_v27, %v367_v26  ;;  %s394_s11 = sshll.u32 %s259_s9, 4  ;;  %s392_s22 = scalar_lea.hbm %s1090_s3, %s551_s8  ;;  %s395_s11 = int_to_ptr.vmem [resolvable:$true] %s394_s11 }
 0x15f   : > { %s376_s30 = scalar_lea.sflag [#allocation4], %s1008_s28  ;;  %s764_s29 = scalar_lea.vmem %s395_s11, 16 }
 0x160   : > { %v370_v29 = vrot.slane %v369_v28, 2  ;;  %p765_p10 = scmp.ne.s32.totalorder %s395_s11, %s764_s29  ;;  %s861_s27 = smov [#allocation8]  }
 0x161   : > { %s768_s10 = sshll.u32 %s861_s27, 4  ;;  %s769_s10 = int_to_ptr.vmem [resolvable:$false] %s768_s10 }
 0x162   : > { %v371_v30 = vadd.f32 %v370_v29, %v369_v28  ;;  %p766_p5 = pnand %p765_p10, %p981_p0  ;;  %s770_s18 = scalar_lea.vmem %s769_s10, 32 }
 0x163   : > { %p771_p9 = scmp.lt.s32.totalorder %s395_s11, %s769_s10  ;;  %p772_p12 = scmp.lt.s32.totalorder %s770_s18, %s764_s29 }
 0x164   : > { %v372_v31 = vrot.slane %v371_v30, 1  ;;  %p767_p7 = pneg %p766_p5 }
 0x165   : > { %p773_p13 = por %p772_p12, %p771_p9 }
 0x166   : > { %v373_v32 = vadd.f32 %v372_v31, %v371_v30 }
 0x167   : > { %p774_p1 = pnand %p773_p13, %p767_p7 }
 0x168   : > { %374 = vst [vmem:[%s259_s9] sm:$0x1] %v373_v32 }
 0x169   : > { %777 = shalt.err (!%p774_p1)
}
 0x16a   : > { %s778_s24 = scalar_lea.hbm %s392_s22, 16  ;;  %s782_s7 = scalar_lea.hbm %s1090_s3, 64 }
 0x16b   : > { %p779_p2 = scmp.ne.s32.totalorder %s392_s22, %s778_s24  ;;  %p783_p8 = scmp.lt.s32.totalorder %s392_s22, %s1090_s3 }
 0x16c   : > { %p784_p11 = scmp.lt.s32.totalorder %s782_s7, %s778_s24 }
 0x16d   : > { %p780_p4 = pnand %p779_p2, %p981_p0 }
 0x16e   : > { %p785_p3 = por %p784_p11, %p783_p8 }
 0x16f   : > { %p781_p6 = pneg %p780_p4 }
 0x171   : > { %p786_p10 = pnand %p785_p3, %p781_p6 }
 0x173   : > { %789 = shalt.err (!%p786_p10)
}
 0x174   : > { %572 = dma.vmem_to_hbm [thread:$0]  (%p981_p0), %s395_s11, 16, %s392_s22, %s376_s30  }
 0x175 PF: > { %p599_p5 = scmp.ge.s32.totalorder %s852_s20, 2  ;;  %s420_s8 = sand.u32 1, %s832_s15  }
 0x176   : > { %p1108_p7 = scmp.ne.s32.totalorder %s1099_s26, 0  ;;  %s421_s9 = scalar_lea.sflag [#allocation4], %s420_s8 }
 0x178   : > { %p588_p9 = pnand %p599_p5, %p1108_p7 }
 0x17a   : > { %p589_p12 = pneg %p588_p9 }
 0x17c   : > { %823 = dma.done.wait (%p589_p12), %s421_s9, 16  }
 0x17d   : > { %825 = vsyncadd (%p589_p12), %s421_s9, 4294967280  ;;  %s429_s12 = scalar_lea.sflag [#allocation10], %s420_s8 }
 0x17e   : > { %827 = dma.done.wait (%p589_p12), %s429_s12, 128  }
 0x17f   : > { %829 = vsyncadd (%p589_p12), %s429_s12, 4294967168  ;;  %s25_s20 = sadd.s32 1, %s852_s20   ;;  %s1109_s15 = smov %s836_s16 }
 0x180   : > { %p22_p13 = scmp.ge.s32.totalorder %s25_s20, 6   ;;  %s1110_s16 = smov %s840_s17 }
 0x181   : > { %s1111_s17 = smov %s990_s5  ;;  %s1112_s18 = smov %s848_s19 }
 0x182   : > { %s1113_s19 = smov %s1115_s13  ;;  %24 = sbr.rel (!%p22_p13) target bundleno = 9 (0x9), region = 102 }
 0x187   :  { %434 = vsyncpa [#allocation3], 1 }
 0x188   :  { %436 = vsyncpa [#allocation3 + $0x1], 1 }
 0x189   :  { %437 = vsyncpa [#allocation6], 1 }
 0x18a   :  { %438 = vsyncpa [#allocation4], 1 }
 0x18b   :  { %440 = vsyncpa [#allocation4 + $0x1], 1 }
 0x18c   :  { %441 = vsyncpa [#allocation10], 1 }
 0x18d   :  { %443 = vsyncpa [#allocation10 + $0x1], 1 }

</bundles_post_ra>
